<compile_context>
chip_gen: v7x
topology: tpu7x:2x2x1
jax: 0.10.0
libtpu: 0.0.40
codegen_flags: <defaults>
</compile_context>

<pallas_src>
import numpy as np
import jax
import jax.numpy as jnp
from jax import lax
from jax.experimental import pallas as pl
from jax.experimental.pallas import tpu as pltpu

TEMPERATURE = 0.5
INV_TEMPERATURE = 1.0 / TEMPERATURE
EPS = 1e-8  # torch F.cosine_similarity eps


# --------------------------------------------------------------------------- #
# Kernels
# --------------------------------------------------------------------------- #
def _project_normalize_kernel(x_ref, w_ref, b_ref, o_ref):
    """Prologue (runs once): e_n = normalize(x @ W^T + b) for one N-tile.

    x_ref [tn, Dp] bf16, w_ref [Dp, PDp] bf16 (resident), b_ref [1, PDp] f32
    (resident), o_ref [tn, PDp] bf16.
    """
    e = jnp.dot(x_ref[...], w_ref[...],
                preferred_element_type=jnp.float32) + b_ref[...]            # [tn, PDp] f32
    inv_norm = lax.rsqrt(jnp.maximum(jnp.sum(e * e, axis=-1, keepdims=True),
                                     EPS * EPS))                            # [tn, 1]
    o_ref[...] = (e * inv_norm).astype(o_ref.dtype)


def _anchor_loss_kernel(e_ref, tgt_ref, a_ref, pc_ref, albl_ref, o_ref):
    """One anchor tile of the anchor-deduplicated loss.

    e_ref    [N, PDp]     bf16  normalized projected embeddings (resident)
    tgt_ref  [1, N]       int32 labels (resident)
    a_ref    [TA, PDp]    bf16  pre-gathered anchor rows e_n[pairs[pairs[:,0],0]]
    pc_ref   [TA, N]      f32   positive-pair multiplicity per (anchor, column)
    albl_ref [TA, 1]      int32 anchor label (sentinel for padded rows)
    o_ref    [1, 8, 128]  f32   lane-dense per-tile partial sum (replicated)
    """
    # sim = cos(a, e) / T; contract the last dims directly (no materialized e^T).
    sim = lax.dot_general(a_ref[...], e_ref[...], (((1,), (1,)), ((), ())),
                          preferred_element_type=jnp.float32) * INV_TEMPERATURE  # [TA, N]

    # Mask columns sharing the anchor's class; row-wise stable logsumexp.
    is_pos = albl_ref[...] == tgt_ref[...]                                   # [TA, N]
    neg = jnp.where(is_pos, -jnp.inf, sim)
    m = jnp.max(neg, axis=1, keepdims=True)
    m_safe = jnp.where(jnp.isfinite(m), m, 0.0)
    lse = jnp.log(jnp.sum(jnp.exp(neg - m_safe), axis=1, keepdims=True)) + m_safe
    lse = jnp.where(jnp.isfinite(m), lse, -jnp.inf)   # all-masked row -> -inf (matches ref)

    # Per-anchor pair multiplicity: count(a) = sum_j poscount(a, j).
    pc = pc_ref[...]                                                         # [TA, N]
    count = jnp.sum(pc, axis=1, keepdims=True)                               # [TA, 1]

    # sum_p [lse(anchor_p) - pos_sim_p] restricted to this tile; padded anchor
    # rows have count == 0 and pc == 0, so they contribute exactly zero.
    partial = jnp.sum(count * lse) - jnp.sum(pc * sim)
    o_ref[...] = jnp.zeros(o_ref.shape, jnp.float32) + partial


# --------------------------------------------------------------------------- #
# Sizing helpers (generation-aware VMEM budgets, MXU-friendly tiles)
# --------------------------------------------------------------------------- #
def _round_up(a, m):
    return ((a + m - 1) // m) * m


def _vmem_capacity_bytes():
    """Physical VMEM per core (v7x: 64 MiB, v5e/v6e: 128 MiB)."""
    try:
        return int(pltpu.get_tpu_info().vmem_capacity_bytes)
    except Exception:
        return 64 * 1024 * 1024   # conservative fallback (v7x physical size)


def _choose_anchor_tile(NA, N, block_a):
    """Pick the anchor-tile row count: a multiple of 128 when large enough
    (>= 8 always), capped so the ~6 live [tp, N]-f32 row sets (sim, mask, exp,
    pc*sim and the double-buffered poscount stream) fit in ~half of VMEM, and
    split so the 'parallel' grid axis keeps >= 2 tiles (v7x has 2 TCs)."""
    cap = _vmem_capacity_bytes()
    rows_cap = max(8, (cap // 2) // (6 * max(N, 128) * 4))
    na8 = _round_up(NA, 8)
    tp = min(int(block_a), int(rows_cap), na8)
    if tp >= 256:
        tp = (tp // 128) * 128
    else:
        tp = max(8, (tp // 8) * 8)
    if na8 > 8 and _round_up(NA, tp) // tp < 2:
        half = _round_up((na8 + 1) // 2, 8)
        if half >= 128:
            half = _round_up(half, 128)
        tp = max(8, min(tp, half))
    return tp


def _prologue_vmem_limit(tn, Dp, PDp):
    bf16, f32 = 2, 4
    est = (2 * (tn * Dp * bf16 + Dp * PDp * bf16 + PDp * f32 + tn * PDp * bf16)
           + 2 * tn * PDp * f32)
    cap = _vmem_capacity_bytes()
    return int(min(int(cap * 0.85), max(32 * 1024 * 1024, 2 * est)))


def _main_vmem_limit(N, PDp, tp, single_buffer_resident):
    f32, bf16, i32 = 4, 2, 4
    n_l = max(N, 128)
    res_bufs = 1 if single_buffer_resident else 2
    resident = res_bufs * (N * PDp * bf16 + n_l * i32)                 # e_n + target
    per_tile = 2 * (tp * PDp * bf16 + tp * N * f32 + tp * 128 * i32 + 8 * 128 * f32)
    temps = 4 * tp * n_l * f32 + 2 * tp * PDp * f32                    # sim/mask/exp/prod
    est = resident + per_tile + temps
    cap = _vmem_capacity_bytes()
    return int(min(int(cap * 0.85), max(32 * 1024 * 1024, 2 * est)))


# --------------------------------------------------------------------------- #
# Wrapper
# --------------------------------------------------------------------------- #
def decoupled_pairwise_infonce_loss(x, w_t, b, positive_pairs, target, *, block_a=256):
    """x: [N, D] f32 embeddings, w_t: [D, PD] f32 (LazyLinear weight, transposed),
    b: [PD] f32, positive_pairs: [P, 2] int (host/static), target: [N] int.
    Returns the scalar f32 loss of DecoupledPairwiseInfoNCELoss (Linear projector)."""
    N, D = x.shape
    PD = w_t.shape[1]
    Dp = _round_up(D, 128)
    PDp = _round_up(PD, 128)

    # ---- host-side glue: pair bookkeeping is static index plumbing ----------
    # TODO(synk): pair_selector.get_pairs is data-dependent host-side pair
    # enumeration; it stays plain Python/numpy glue (all_positive_pairs below).
    pp = np.asarray(positive_pairs, dtype=np.int32)
    P = pp.shape[0]
    assert P > 0
    # The reference re-indexes sim rows by the anchor (batch) id, which is only
    # well-defined when every anchor id is a valid row of sim (i.e. < P).
    assert int(pp[:, 0].max()) < P
    tgt_np = np.asarray(target, dtype=np.int32)

    # Dedupe by anchor a = pairs[p, 0]: the masked row-logsumexp depends only on
    # (idx2(a) = pairs[a, 0], albl(a) = target[a]), both functions of a alone.
    uniq, inv = np.unique(pp[:, 0], return_inverse=True)
    NA = int(uniq.shape[0])
    idx2_u = pp[uniq, 0].astype(np.int32)            # e_n row per unique anchor (double gather)
    albl_u = tgt_np[uniq].astype(np.int32)           # direct anchor label per unique anchor
    poscount = np.zeros((NA, N), dtype=np.float32)   # multiplicity of (anchor, positive column)
    np.add.at(poscount, (inv, pp[:, 1]), 1.0)

    # ---- anchor tiling (128-multiples when possible, VMEM / megacore aware) --
    tp = _choose_anchor_tile(NA, N, block_a)
    NA_pad = _round_up(NA, tp)
    num_tiles = NA_pad // tp
    pad_a = NA_pad - NA
    pad_label = int(tgt_np.min()) - 1                # sentinel: matches no real label
    idx2_u = np.pad(idx2_u, (0, pad_a))
    albl_u = np.pad(albl_u, (0, pad_a), constant_values=pad_label).reshape(NA_pad, 1)
    poscount = np.pad(poscount, ((0, pad_a), (0, 0)))

    # ---- prologue: e_n = normalize(x @ W^T + b), computed once --------------
    # D / PD are zero-padded to MXU width (exact: zero columns change nothing).
    x_b = jnp.pad(x.astype(jnp.float32), ((0, 0), (0, Dp - D))).astype(jnp.bfloat16)
    w_b = jnp.pad(jnp.asarray(w_t, jnp.float32),
                  ((0, Dp - D), (0, PDp - PD))).astype(jnp.bfloat16)
    b2 = jnp.pad(jnp.asarray(b, jnp.float32), (0, PDp - PD)).reshape(1, PDp)

    tn = N if N <= 512 else 256
    e_n = pl.pallas_call(
        _project_normalize_kernel,
        out_shape=jax.ShapeDtypeStruct((N, PDp), jnp.bfloat16),
        grid=(pl.cdiv(N, tn),),
        in_specs=[pl.BlockSpec((tn, Dp), lambda i: (i, 0)),       # x       (per tile)
                  pl.BlockSpec((Dp, PDp), lambda i: (0, 0)),      # W^T     (resident)
                  pl.BlockSpec((1, PDp), lambda i: (0, 0))],      # bias    (resident)
        out_specs=pl.BlockSpec((tn, PDp), lambda i: (i, 0)),
        compiler_params=pltpu.CompilerParams(
            dimension_semantics=("parallel",),
            vmem_limit_bytes=_prologue_vmem_limit(tn, Dp, PDp)),
    )(x_b, w_b, b2)

    # ---- anchor rows: one device gather (replaces the in-kernel one-hot matmul)
    a_n = jnp.take(e_n, jnp.asarray(idx2_u, dtype=jnp.int32), axis=0)   # [NA_pad, PDp] bf16
    tgt2 = jnp.asarray(tgt_np).reshape(1, N)
    pc = jnp.asarray(poscount)
    albl2 = jnp.asarray(albl_u)

    def _call_main(single_buffer_resident):
        res_kw = ({"pipeline_mode": pl.Buffered(1)}
                  if single_buffer_resident else {})
        return pl.pallas_call(
            _anchor_loss_kernel,
            out_shape=jax.ShapeDtypeStruct((num_tiles, 8, 128), jnp.float32),
            grid=(num_tiles,),
            in_specs=[
                pl.BlockSpec((N, PDp), lambda i: (0, 0), **res_kw),   # e_n      (resident)
                pl.BlockSpec((1, N), lambda i: (0, 0), **res_kw),     # target   (resident)
                pl.BlockSpec((tp, PDp), lambda i: (i, 0)),            # a_n      (per tile)
                pl.BlockSpec((tp, N), lambda i: (i, 0)),              # poscount (per tile)
                pl.BlockSpec((tp, 1), lambda i: (i, 0)),              # anchor labels
            ],
            out_specs=pl.BlockSpec((1, 8, 128), lambda i: (i, 0, 0)),
            compiler_params=pltpu.CompilerParams(
                dimension_semantics=("parallel",),
                vmem_limit_bytes=_main_vmem_limit(N, PDp, tp, single_buffer_resident)),
        )(e_n, tgt2, a_n, pc, albl2)

    try:
        # Review item: single-buffer the constant-index_map (resident) inputs.
        partials = _call_main(True)
    except Exception:
        # pl.Buffered(1) not supported by this jax/Mosaic build -> default buffering.
        partials = _call_main(False)

    return jnp.sum(partials[:, 0, 0])


# --------------------------------------------------------------------------- #
# Host-side pair selector + references + demo
# --------------------------------------------------------------------------- #
def all_positive_pairs(labels_np):
    pairs = []
    n = len(labels_np)
    for i in range(n):
        for j in range(i + 1, n):
            if labels_np[i] == labels_np[j]:
                pairs.append((i, j))
    return np.asarray(pairs, dtype=np.int32)


def _reference_loss_torch_f32(x, w_t, b, pairs, target):
    # Pure-f32 JAX mirror of the torch forward (Linear projector).
    e = x @ w_t + b
    a = e[pairs[:, 0]]
    w12 = a @ e.T
    w1 = jnp.sum(a * a, -1, keepdims=True)
    w2 = jnp.sum(e * e, -1, keepdims=True)
    sim = w12 / jnp.sqrt(jnp.maximum(w1 * w2.T, EPS * EPS)) / TEMPERATURE
    pos = target[pairs[:, 0], None] == target[None]
    neg_mask = jnp.where(pos, -jnp.inf, 0.0)
    pos_sim = sim[pairs[:, 0], pairs[:, 1]][:, None]
    neg_sim = sim[pairs[:, 0]] + neg_mask - pos_sim
    return jax.scipy.special.logsumexp(neg_sim, axis=1).sum()


def _reference_loss_matched(x, w_t, b, pairs, target):
    # Same math as the kernels (bf16 matmuls, per-row rsqrt, pos_sim folded after lse).
    e = jnp.dot(x.astype(jnp.bfloat16), w_t.astype(jnp.bfloat16),
                preferred_element_type=jnp.float32) + b
    inv_norm = lax.rsqrt(jnp.maximum(jnp.sum(e * e, -1, keepdims=True), EPS * EPS))
    e_n = (e * inv_norm).astype(jnp.bfloat16)
    idx2 = pairs[pairs[:, 0], 0]
    a_n = e_n[idx2]
    sim = lax.dot_general(a_n, e_n, (((1,), (1,)), ((), ())),
                          preferred_element_type=jnp.float32) * INV_TEMPERATURE
    pos = target[pairs[:, 0], None] == target[None]
    p = pairs.shape[0]
    pos_sim = sim[jnp.arange(p), pairs[:, 1]]
    neg = jnp.where(pos, -jnp.inf, sim)
    return jnp.sum(jax.scipy.special.logsumexp(neg, axis=1) - pos_sim)


if __name__ == "__main__":
    key = jax.random.PRNGKey(0)
    N, D, PD = 16, 32, 16                      # batch, embed dim, project_dim

    kx, kw, kb = jax.random.split(key, 3)
    x = jax.random.normal(kx, (N, D), dtype=jnp.float32)           # embeddings
    # deterministic LazyLinear(project_dim) params: W [PD, D], bias [PD]
    w = jax.random.normal(kw, (PD, D), dtype=jnp.float32) * 0.1
    bias = jax.random.normal(kb, (PD,), dtype=jnp.float32) * 0.1
    w_t = w.T                                                      # [D, PD]

    labels_np = np.array([0] * 8 + [1] * 8, dtype=np.int32)
    target = jnp.asarray(labels_np)
    pairs_np = all_positive_pairs(labels_np)                       # [56, 2]

    # block_a=8 -> 14 unique anchors padded to 16 -> 2 parallel anchor tiles,
    # exercising the multi-tile grid even at demo size.
    loss = decoupled_pairwise_infonce_loss(x, w_t, bias, pairs_np, target, block_a=8)
    jax.block_until_ready(loss)

    pairs = jnp.asarray(pairs_np)
    ref_matched = _reference_loss_matched(x, w_t, bias, pairs, target)
    ref_f32 = _reference_loss_torch_f32(x, w_t, bias, pairs, target)

    assert bool(jnp.isfinite(loss)), float(loss)
    # Tight check against a reference using identical bf16/rsqrt math (kernel logic).
    assert jnp.allclose(loss, ref_matched, rtol=5e-3, atol=5e-3), (float(loss), float(ref_matched))
    # Loose check against the pure-f32 torch-semantics forward (bf16 matmul error).
    assert jnp.allclose(loss, ref_f32, rtol=5e-2, atol=5e-2), (float(loss), float(ref_f32))
    print("KERNEL_OK")
</pallas_src>

<mosaic_0001>
module attributes {stable_mosaic.version = 11 : i64} {
  func.func @_project_normalize_kernel(%arg0: i32, %arg1: memref<16x128xbf16, #tpu.memory_space<vmem>>, %arg2: memref<128x128xbf16, #tpu.memory_space<vmem>>, %arg3: memref<1x128xf32, #tpu.memory_space<vmem>>, %arg4: memref<16x128xbf16, #tpu.memory_space<vmem>>) attributes {dimension_semantics = [#tpu.dimension_semantics<parallel>], iteration_bounds = array<i64: 1>, scalar_prefetch = 0 : i64, scratch_operands = 0 : i64, tpu.core_type = #tpu.core_type<tc>, window_params = [{transform_indices = @transform_0, window_bounds = array<i64: 16, 128>}, {pipeline_mode = #tpu.pipeline_mode<synchronous>, transform_indices = @transform_1, window_bounds = array<i64: 128, 128>}, {pipeline_mode = #tpu.pipeline_mode<synchronous>, transform_indices = @transform_2, window_bounds = array<i64: 1, 128>}, {transform_indices = @transform_3, window_bounds = array<i64: 16, 128>}]} {
    %c0 = arith.constant 0 : index
    %c0_0 = arith.constant 0 : index
    %0 = vector.load %arg1[%c0, %c0_0] : memref<16x128xbf16, #tpu.memory_space<vmem>>, vector<16x128xbf16>
    %c0_1 = arith.constant 0 : index
    %c0_2 = arith.constant 0 : index
    %1 = vector.load %arg2[%c0_1, %c0_2] : memref<128x128xbf16, #tpu.memory_space<vmem>>, vector<128x128xbf16>
    %cst = arith.constant dense<0.000000e+00> : vector<16x128xf32>
    %2 = tpu.matmul %0, %1, %cst {dimension_numbers = #tpu.dot_dimension_numbers<[1], [0], [0], [1], [0, 0, 1, 1], [], []>} : vector<16x128xbf16>, vector<128x128xbf16>, vector<16x128xf32> -> vector<16x128xf32>
    %c0_3 = arith.constant 0 : index
    %c0_4 = arith.constant 0 : index
    %3 = vector.load %arg3[%c0_3, %c0_4] : memref<1x128xf32, #tpu.memory_space<vmem>>, vector<1x128xf32>
    %4 = vector.broadcast %3 : vector<1x128xf32> to vector<16x128xf32>
    %5 = arith.addf %2, %4 : vector<16x128xf32>
    %6 = arith.mulf %5, %5 : vector<16x128xf32>
    %cst_5 = arith.constant dense<0.000000e+00> : vector<16xf32>
    %7 = vector.multi_reduction <add>, %6, %cst_5 [1] : vector<16x128xf32> to vector<16xf32>
    %8 = vector.shape_cast %7 : vector<16xf32> to vector<16x1xf32>
    %cst_6 = arith.constant 1.000000e-16 : f32
    %9 = vector.broadcast %cst_6 : f32 to vector<16x1xf32>
    %10 = arith.maximumf %8, %9 : vector<16x1xf32>
    %11 = math.rsqrt %10 : vector<16x1xf32>
    %12 = vector.broadcast %11 : vector<16x1xf32> to vector<16x128xf32>
    %13 = arith.mulf %5, %12 : vector<16x128xf32>
    %14 = arith.truncf %13 : vector<16x128xf32> to vector<16x128xbf16>
    %c0_7 = arith.constant 0 : index
    %c0_8 = arith.constant 0 : index
    %15 = vector.load %arg4[%c0_7, %c0_8] : memref<16x128xbf16, #tpu.memory_space<vmem>>, vector<16x128xbf16>
    tpu.vector_store %arg4[%c0_7, %c0_8], %14 {strides = array<i32>} : memref<16x128xbf16, #tpu.memory_space<vmem>>, vector<16x128xbf16>,
    return
  }
  func.func @transform_0(%arg0: i32) -> (i32, i32) {
    %c0_i32 = arith.constant 0 : i32
    %c0_i32_0 = arith.constant 0 : i32
    return %arg0, %c0_i32 : i32, i32
  }
  func.func @transform_1(%arg0: i32) -> (i32, i32) {
    %c0_i32 = arith.constant 0 : i32
    %c0_i32_0 = arith.constant 0 : i32
    %c0_i32_1 = arith.constant 0 : i32
    return %c0_i32, %c0_i32_0 : i32, i32
  }
  func.func @transform_2(%arg0: i32) -> (i32, i32) {
    %c0_i32 = arith.constant 0 : i32
    %c0_i32_0 = arith.constant 0 : i32
    %c0_i32_1 = arith.constant 0 : i32
    return %c0_i32, %c0_i32_0 : i32, i32
  }
  func.func @transform_3(%arg0: i32) -> (i32, i32) {
    %c0_i32 = arith.constant 0 : i32
    %c0_i32_0 = arith.constant 0 : i32
    return %arg0, %c0_i32 : i32, i32
  }
}

</mosaic_0001>

<bundles_post_ra>
// kernel: tpu_custom_call.1
= control target key start
LH: loop header
LB: loop body
LE: loop exit
PB: predicated region body
PF: predicated region fallthrough
CT: control target
= control target key end

     0   :  { %8 = vsyncpa [#allocation3], 0  ;;  %s419_s0 = inlined_call_operand.hbm [shape: bf16[16,128], index: 0, kind: input, shape index: {}]   ;;  %s420_s1 = inlined_call_operand.hbm [shape: bf16[128,128], index: 1, kind: input, shape index: {}]   ;;  %s421_s2 = inlined_call_operand.vmem [shape: f32[1,128], index: 2, kind: input, shape index: {}]   ;;  %s422_s3 = inlined_call_operand.hbm [shape: bf16[16,128], index: 3, kind: output, shape index: {}]  }
   0x1   :  { %9 = vsyncpa [#allocation6], 0 }
   0x2   :  { %10 = vsyncpa [#allocation4], 0  ;;  %s344_s12 = smov [#allocation2]   ;;  %s272_s16 = scalar_lea.hbm %s419_s0, 128 }
   0x3   :  { %s16_s13 = sshll.u32 %s344_s12, 4  ;;  %p273_p0 = scmp.ne.s32.totalorder %s419_s0, %s272_s16  ;;  %s17_s13 = int_to_ptr.vmem [resolvable:$true] %s16_s13 }
   0x4   :  { %p276_p1 = scmp.lt.u32.totalorder %s272_s16, %s419_s0 }
   0x6   :  { %p278_p2 = pnand %p276_p1, %p273_p0 }
   0x8   :  { %281 = shalt.err (!%p278_p2)
}
   0x9   :  { %s282_s21 = scalar_lea.vmem %s17_s13, 128  ;;  %p287_p4 = scmp.lt.s32.totalorder %s17_s13, %s17_s13 }
   0xa   :  { %p283_p3 = scmp.ne.s32.totalorder %s17_s13, %s282_s21  ;;  %p288_p5 = scmp.lt.s32.totalorder %s282_s21, %s282_s21 }
   0xc   :  { %p289_p6 = por %p288_p5, %p287_p4 }
   0xe   :  { %p290_p7 = pnand %p289_p6, %p283_p3 }
  0x10   :  { %293 = shalt.err (!%p290_p7)
}
  0x11   :  { %s345_s22 = smov 64   ;;  %s346_s23 = smov 4  }
  0x12   :  { %22 = dma.hbm_to_vmem [thread:$0]  %s419_s0, 128, %s17_s13, [#allocation3], %s345_s22, %s345_s22, %s346_s23  }
  0x13   :  { %s347_s26 = smov [#allocation5]   ;;  %s294_s30 = scalar_lea.hbm %s420_s1, 1024 }
  0x14   :  { %s28_s27 = sshll.u32 %s347_s26, 4  ;;  %p295_p8 = scmp.ne.s32.totalorder %s420_s1, %s294_s30  ;;  %s29_s27 = int_to_ptr.vmem [resolvable:$true] %s28_s27 }
  0x15   :  { %p298_p9 = scmp.lt.u32.totalorder %s294_s30, %s420_s1 }
  0x17   :  { %p300_p10 = pnand %p298_p9, %p295_p8 }
  0x19   :  { %303 = shalt.err (!%p300_p10)
}
  0x1a   :  { %s304_s8 = scalar_lea.vmem %s29_s27, 1024  ;;  %p309_p12 = scmp.lt.s32.totalorder %s29_s27, %s29_s27 }
  0x1b   :  { %p305_p11 = scmp.ne.s32.totalorder %s29_s27, %s304_s8  ;;  %p310_p13 = scmp.lt.s32.totalorder %s304_s8, %s304_s8 }
  0x1d   :  { %p311_p0 = por %p310_p13, %p309_p12 }
  0x1f   :  { %p312_p1 = pnand %p311_p0, %p305_p11 }
  0x21   :  { %315 = shalt.err (!%p312_p1)
}
  0x22   :  { %34 = dma.hbm_to_vmem [thread:$0]  %s420_s1, 1024, %s29_s27, [#allocation6], %s345_s22, %s345_s22, %s346_s23  }
  0x23   :  { %338 = dma.done.wait [#allocation3], 128  }
  0x24   :  { %339 = vsyncadd [#allocation3], 4294967168 }
  0x25   :  { %340 = dma.done.wait [#allocation6], 1024  }
  0x26   :  { %341 = vsyncadd [#allocation6], 4294966272  ;;  %v348_v0 = vmov 0.0   ;;  %vm349_vm0 = vmmov 0   ;;  %v259_v1 = vld [vmem:[#allocation5] sm:$0xff]   ;;  %v260_v2 = vld [vmem:[#allocation5 + $0x8] sm:$0xff]  }
  0x27   :  { %232 = vmatprep.subr.bf16.mxu0 %v348_v0  ;;  %248 = vmatprep.mubr.msk.bf16.mxu0 %vm349_vm0, %v348_v0  ;;  %v261_v3 = vld [vmem:[#allocation5 + $0x10] sm:$0xff]   ;;  %v262_v4 = vld [vmem:[#allocation5 + $0x18] sm:$0xff]   ;;  %v263_v5 = vld [vmem:[#allocation5 + $0x20] sm:$0xff]   ;;  %s350_s11 = smov [#allocation7]  }
  0x28   :  { %233 = vmatpush3.bf16.msra.mxu0 %v259_v1  ;;  %v264_v6 = vld [vmem:[#allocation5 + $0x28] sm:$0xff]   ;;  %v265_v7 = vld [vmem:[#allocation5 + $0x30] sm:$0xff]   ;;  %v266_v8 = vld [vmem:[#allocation5 + $0x38] sm:$0xff]  }
  0x29   :  { %234 = vmatprep.subr.bf16.mxu0 %v348_v0  ;;  %v267_v9 = vld [vmem:[#allocation2] sm:$0xff]  }
  0x2a   :  { %v204_v10 = vld [vmem:[%s421_s2] ss:$0 sm:$0xff]  ;;  %s191_s2 = sshll.u32 %s350_s11, 4  ;;  %s192_s2 = int_to_ptr.vmem [resolvable:$true] %s191_s2 }
  0x2b   :  { %s316_s12 = scalar_lea.vmem %s192_s2, 128  ;;  %p321_p3 = scmp.lt.s32.totalorder %s192_s2, %s192_s2 }
  0x2c   :  { %235 = vmatpush3.bf16.msra.mxu0 %v260_v2  ;;  %p317_p2 = scmp.ne.s32.totalorder %s192_s2, %s316_s12  ;;  %p322_p4 = scmp.lt.s32.totalorder %s316_s12, %s316_s12 }
  0x2d   :  { %236 = vmatprep.subr.bf16.mxu0 %v348_v0 }
  0x2e   :  { %p323_p5 = por %p322_p4, %p321_p3 }
  0x30   :  { %237 = vmatpush3.bf16.msra.mxu0 %v261_v3  ;;  %p324_p6 = pnand %p323_p5, %p317_p2 }
  0x31   :  { %238 = vmatprep.subr.bf16.mxu0 %v348_v0 }
  0x34   :  { %239 = vmatpush3.bf16.msra.mxu0 %v262_v4 }
  0x35   :  { %240 = vmatprep.subr.bf16.mxu0 %v348_v0 }
  0x38   :  { %241 = vmatpush3.bf16.msra.mxu0 %v263_v5 }
  0x39   :  { %242 = vmatprep.subr.bf16.mxu0 %v348_v0 }
  0x3c   :  { %243 = vmatpush3.bf16.msra.mxu0 %v264_v6 }
  0x3d   :  { %244 = vmatprep.subr.bf16.mxu0 %v348_v0 }
  0x40   :  { %245 = vmatpush3.bf16.msra.mxu0 %v265_v7 }
  0x41   :  { %246 = vmatprep.subr.bf16.mxu0 %v348_v0 }
  0x44   :  { %247 = vmatpush3.bf16.msra.mxu0 %v266_v8 }
  0x47   :  { %249 = vmatmul.mubr.bf16.vlgmr.msra.gmra.mrb[0].mxu0 %v267_v9 }
 0x11a   :  { %v157_v11 = vpop.f32.mrb[0].mxu0 }
 0x11b   :  { %v158_v12 = vadd.f32 %v204_v10, %v157_v11  ;;  %v250_v13 = vpop.f32.mrb[1].mxu0 }
 0x11c   :  { %v160_v14 = vpop.f32.mrb[2].mxu0 }
 0x11d   :  { %v161_v15 = vadd.f32 %v204_v10, %v160_v14  ;;  %v251_v16 = vpop.f32.mrb[3].mxu0  ;;  %v164_v17 = vmul.f32 %v158_v12, %v158_v12 }
 0x11f   :  { %166 = vadd.xlane.f32.xlu0 %v164_v17  ;;  %v165_v18 = vmul.f32 %v161_v15, %v161_v15 }
 0x123   :  { %168 = vadd.xlane.f32.xlu0 %v165_v18 }
 0x1ac   :  { %v167_v19 = vpop.xlane.xlu0 %166 }
 0x1ad   :  { %v170_v20 = vmax.f32 %v167_v19, 1e-16 }
 0x1af   :  { %268 = vrsqrt.f32 %v170_v20 }
 0x1b0   :  { %v169_v21 = vpop.xlane.xlu0 %168 }
 0x1b1   :  { %v171_v22 = vmax.f32 %v169_v21, 1e-16 }
 0x1b3   :  { %270 = vrsqrt.f32 %v171_v22 }
 0x1b9   :  { %v269_v23 = vpop.eup %268 }
 0x1ba   :  { %v174_v25 = vmul.f32 %v269_v23, %v158_v12 }
 0x1bd   :  { %v271_v24 = vpop.eup %270 }
 0x1be   :  { %v175_v26 = vmul.f32 %v271_v24, %v161_v15 }
 0x1c0   :  { %v221_v27 = vpack.c.bf16 %v175_v26, %v174_v25 }
 0x1c2   :  { %222 = vst [vmem:[#allocation7] sm:$0xff] %v221_v27  }
 0x1c3   :  { %327 = shalt.err (!%p324_p6)
}
 0x1c4   :  { %s328_s15 = scalar_lea.hbm %s422_s3, 128 }
 0x1c5   :  { %p329_p7 = scmp.ne.s32.totalorder %s422_s3, %s328_s15  ;;  %p332_p8 = scmp.lt.u32.totalorder %s328_s15, %s422_s3 }
 0x1c7   :  { %p334_p9 = pnand %p332_p8, %p329_p7 }
 0x1c9   :  { %337 = shalt.err (!%p334_p9)
}
 0x1ca   :  { %197 = dma.vmem_to_hbm [thread:$0]  %s192_s2, 128, %s422_s3, [#allocation4], %s345_s22, %s345_s22, %s346_s23  }
 0x1cb   :  { %342 = dma.done.wait [#allocation4], 128  }
 0x1cc   :  { %343 = vsyncadd [#allocation4], 4294967168 }
 0x1cd   :  { %201 = vsyncpa [#allocation3], 1 }
 0x1ce   :  { %202 = vsyncpa [#allocation6], 1 }
 0x1cf   :  { %203 = vsyncpa [#allocation4], 1 }

</bundles_post_ra>
